<compile_context>
chip_gen: v7x
topology: tpu7x:2x2x1
jax: 0.10.0
libtpu: 0.0.40
codegen_flags: <defaults>
</compile_context>

<pallas_src>
import functools
import math
import re

import jax
import jax.numpy as jnp
from jax.experimental import pallas as pl
from jax.experimental.pallas import tpu as pltpu


_LANE = 128          # lane quantum (last dim)
_SUBLANE = 8         # f32/bf16-block sublane quantum (second-to-last dim)
_MIB = 1024 * 1024
_INV_SQRT2 = 1.0 / math.sqrt(2.0)


def _cdiv(a, b):
    return -(-a // b)


def _round_up(x, m):
    return _cdiv(x, m) * m


def _vmem_budget_bytes():
    """Per-TensorCore VMEM budget, generation-aware with a safe fallback."""
    cap = 64 * _MIB                      # v7x has the smallest per-core VMEM
    try:
        info = pltpu.get_tpu_info()
        cap = int(getattr(info, "vmem_capacity_bytes", cap)) or cap
    except Exception:
        pass
    return int(cap * 0.8)                # headroom for compiler-internal scratch


def _vmem_limit(need, budget):
    # Never below the default scoped limit; never artificially below `need`.
    return int(min(max(32 * _MIB, 2 * need), max(budget, need)))


def _largest_divisor_tile(total, cap, quantum=_LANE):
    """Largest multiple of `quantum` that divides `total` and is <= cap."""
    cap = min(cap, total)
    t = max(quantum, (cap // quantum) * quantum)
    while t > quantum and total % t != 0:
        t -= quantum
    return t


def _gelu(x, approximate):
    if approximate:
        # tanh approximation -> EUP slot (idle next to MXU/VALU)
        return jax.nn.gelu(x, approximate=True)
    # exact erf formulation == torch.nn.GELU() default (kept for parity)
    return 0.5 * x * (1.0 + jax.lax.erf(x * _INV_SQRT2))


# ----------------------------- kernels --------------------------------------


def _linear_kernel(x_ref, w_ref, b_ref, o_ref):
    # o = x @ W + b.  Operands arrive already in the compute dtype (bf16 by
    # default) so the MXU runs its native path; accumulate in f32.
    acc = jnp.dot(x_ref[...], w_ref[...], preferred_element_type=jnp.float32)
    o_ref[...] = (acc + b_ref[...]).astype(o_ref.dtype)


def _mlp2x_resident_kernel(x_ref, w1_ref, b1_ref, w2_ref, b2_ref, o_ref, *,
                           approx_gelu):
    # Fused o = gelu(x @ W1 + b1) @ W2 + b2 with both weights resident in VMEM
    # (single-buffered): zero weight re-streaming across M tiles.
    h = jnp.dot(x_ref[...], w1_ref[...], preferred_element_type=jnp.float32)
    h = _gelu(h + b1_ref[...], approx_gelu)
    acc = jnp.dot(h.astype(w2_ref.dtype), w2_ref[...],
                  preferred_element_type=jnp.float32)
    o_ref[...] = (acc + b2_ref[...]).astype(o_ref.dtype)


def _mlp2x_chunked_kernel(x_ref, w1_ref, b1_ref, w2_ref, b2_ref, o_ref,
                          *scratch, approx_gelu):
    # Fallback: hidden dim chunked on grid axis 1 (K of the second matmul).
    # If the output dtype is f32 the resident output block itself is the
    # accumulator (no scratch); otherwise an f32 VMEM scratch is used.
    acc_ref = scratch[0] if scratch else o_ref
    k = pl.program_id(1)

    @pl.when(k == 0)
    def _():
        acc_ref[...] = jnp.zeros_like(acc_ref)

    h = jnp.dot(x_ref[...], w1_ref[...], preferred_element_type=jnp.float32)
    h = _gelu(h + b1_ref[...], approx_gelu)
    acc_ref[...] += jnp.dot(h.astype(w2_ref.dtype), w2_ref[...],
                            preferred_element_type=jnp.float32)

    @pl.when(k == pl.num_programs(1) - 1)
    def _():
        o_ref[...] = (acc_ref[...] + b2_ref[...]).astype(o_ref.dtype)


# ----------------------------- pallas_call wrappers --------------------------


def _proj_linear(x2d, w_t, b, *, tile_m, out_dtype, budget):
    M, d_in = x2d.shape
    d_out_p = w_t.shape[1]
    xsz = x2d.dtype.itemsize
    wsz = w_t.dtype.itemsize
    osz = jnp.dtype(out_dtype).itemsize

    def need(tm, tn):
        wbufs = 1 if tn == d_out_p else 2       # resident vs. streamed columns
        return (2 * tm * d_in * xsz             # x tile    (double buffered)
                + wbufs * d_in * tn * wsz       # weight cols
                + wbufs * tn * 4                # bias cols (f32)
                + 2 * tm * tn * osz             # out tile  (double buffered)
                + tm * tn * 4)                  # f32 matmul result headroom

    # Prefer the whole weight resident; only tile d_out (v7x / huge d_out)
    # when the resident layout cannot fit the per-core budget.
    tile_n = d_out_p
    while need(tile_m, tile_n) > budget and tile_n > _LANE:
        tile_n = _largest_divisor_tile(d_out_p, tile_n - _LANE)
    while (need(tile_m, tile_n) > budget and tile_m > _SUBLANE
           and tile_m % _SUBLANE == 0):
        tile_m = max(_SUBLANE, _round_up(tile_m // 2, _SUBLANE))

    n_tiles = d_out_p // tile_n
    grid = (_cdiv(M, tile_m), n_tiles)          # ragged last M block is fine

    if n_tiles == 1:
        # Grid-invariant weight/bias: keep a single resident copy.
        w_spec = pl.BlockSpec((d_in, tile_n), lambda i, j: (0, 0),
                              pipeline_mode=pl.Buffered(1))
        b_spec = pl.BlockSpec((1, tile_n), lambda i, j: (0, 0),
                              pipeline_mode=pl.Buffered(1))
    else:
        w_spec = pl.BlockSpec((d_in, tile_n), lambda i, j: (0, j))
        b_spec = pl.BlockSpec((1, tile_n), lambda i, j: (0, j))

    return pl.pallas_call(
        _linear_kernel,
        out_shape=jax.ShapeDtypeStruct((M, d_out_p), out_dtype),
        grid_spec=pltpu.PrefetchScalarGridSpec(
            num_scalar_prefetch=0,
            grid=grid,
            in_specs=[
                pl.BlockSpec((tile_m, d_in), lambda i, j: (i, 0)),
                w_spec,
                b_spec,
            ],
            out_specs=pl.BlockSpec((tile_m, tile_n), lambda i, j: (i, j)),
        ),
        compiler_params=pltpu.CompilerParams(
            dimension_semantics=("parallel", "parallel"),
            vmem_limit_bytes=_vmem_limit(need(tile_m, tile_n), budget)),
    )(x2d, w_t, b)


def _proj_mlp2x(x2d, w1_t, b1, w2_t, b2, *, tile_m, tile_k, out_dtype, budget,
                resident, approx_gelu):
    M, d_in = x2d.shape
    d_h_p = w1_t.shape[1]                 # padded hidden dim (== padded d_out)
    d_out_p = w2_t.shape[1]
    xsz = x2d.dtype.itemsize
    wsz = w1_t.dtype.itemsize
    osz = jnp.dtype(out_dtype).itemsize

    # ---------- preferred: resident weights, single M grid axis -------------
    def resident_need(tm):
        return (2 * tm * d_in * xsz                      # x tile
                + d_in * d_h_p * wsz + d_h_p * 4         # W1 + b1 (resident)
                + d_h_p * d_out_p * wsz + d_out_p * 4    # W2 + b2 (resident)
                + 2 * tm * d_out_p * osz                 # out tile
                + 2 * tm * d_h_p * 4                     # f32 hidden (+ cast)
                + tm * d_out_p * 4)                      # f32 2nd matmul result

    tm = tile_m
    if resident is not False:
        # Resident weights remove the per-M-tile weight re-streaming — the
        # dominant DMA term for realistic M. Shrink tile_m until it fits.
        while resident_need(tm) > budget and tm > 128 and tm % _SUBLANE == 0:
            tm = max(128, _round_up(tm // 2, _SUBLANE))
        use_resident = (resident is True) or (resident_need(tm) <= budget)
    else:
        use_resident = False

    if use_resident:
        kernel = functools.partial(_mlp2x_resident_kernel,
                                   approx_gelu=approx_gelu)
        return pl.pallas_call(
            kernel,
            out_shape=jax.ShapeDtypeStruct((M, d_out_p), out_dtype),
            grid_spec=pltpu.PrefetchScalarGridSpec(
                num_scalar_prefetch=0,
                grid=(_cdiv(M, tm),),
                in_specs=[
                    pl.BlockSpec((tm, d_in), lambda i: (i, 0)),
                    pl.BlockSpec((d_in, d_h_p), lambda i: (0, 0),
                                 pipeline_mode=pl.Buffered(1)),
                    pl.BlockSpec((1, d_h_p), lambda i: (0, 0),
                                 pipeline_mode=pl.Buffered(1)),
                    pl.BlockSpec((d_h_p, d_out_p), lambda i: (0, 0),
                                 pipeline_mode=pl.Buffered(1)),
                    pl.BlockSpec((1, d_out_p), lambda i: (0, 0),
                                 pipeline_mode=pl.Buffered(1)),
                ],
                out_specs=pl.BlockSpec((tm, d_out_p), lambda i: (i, 0)),
            ),
            compiler_params=pltpu.CompilerParams(
                dimension_semantics=("parallel",),
                vmem_limit_bytes=_vmem_limit(resident_need(tm), budget)),
        )(x2d, w1_t, b1, w2_t, b2)

    # ---------- fallback: hidden dim chunked on an "arbitrary" K axis -------
    tm = tile_m
    use_scratch = jnp.dtype(out_dtype) != jnp.float32
    tk = tile_k if tile_k is not None else min(512, d_h_p)
    tk = _largest_divisor_tile(d_h_p, tk)

    def chunked_need(tm_, tk_):
        return (2 * tm_ * d_in * xsz                     # x tile
                + 2 * d_in * tk_ * wsz + 2 * tk_ * 4     # W1 / b1 chunk
                + 2 * tk_ * d_out_p * wsz                # W2 chunk
                + d_out_p * 4                            # b2 (resident)
                + 2 * tm_ * d_out_p * osz                # out tile
                + (tm_ * d_out_p * 4 if use_scratch else 0)
                + 2 * tm_ * tk_ * 4)                     # f32 hidden chunk

    while chunked_need(tm, tk) > budget and tk > _LANE:
        tk = _largest_divisor_tile(d_h_p, tk - _LANE)
    while (chunked_need(tm, tk) > budget and tm > _SUBLANE
           and tm % _SUBLANE == 0):
        tm = max(_SUBLANE, _round_up(tm // 2, _SUBLANE))

    kernel = functools.partial(_mlp2x_chunked_kernel, approx_gelu=approx_gelu)
    scratch = [pltpu.VMEM((tm, d_out_p), jnp.float32)] if use_scratch else []
    return pl.pallas_call(
        kernel,
        out_shape=jax.ShapeDtypeStruct((M, d_out_p), out_dtype),
        grid_spec=pltpu.PrefetchScalarGridSpec(
            num_scalar_prefetch=0,
            grid=(_cdiv(M, tm), d_h_p // tk),      # reduction (hidden) last
            in_specs=[
                pl.BlockSpec((tm, d_in), lambda i, k: (i, 0)),
                pl.BlockSpec((d_in, tk), lambda i, k: (0, k)),
                pl.BlockSpec((1, tk), lambda i, k: (0, k)),
                pl.BlockSpec((tk, d_out_p), lambda i, k: (k, 0)),
                pl.BlockSpec((1, d_out_p), lambda i, k: (0, 0),
                             pipeline_mode=pl.Buffered(1)),
            ],
            out_specs=pl.BlockSpec((tm, d_out_p), lambda i, k: (i, 0)),
            scratch_shapes=scratch,
        ),
        compiler_params=pltpu.CompilerParams(
            dimension_semantics=("parallel", "arbitrary"),
            vmem_limit_bytes=_vmem_limit(chunked_need(tm, tk), budget)),
    )(x2d, w1_t, b1, w2_t, b2)


# ----------------------------- module ----------------------------------------


class LinearPatchProjection:
    """JAX/Pallas port of the PyTorch LinearPatchProjection forward pass."""

    def __init__(self, mm_projector_type, *, dim_visual, dim_out, num_patches,
                 key, compute_dtype=jnp.bfloat16, out_dtype=None,
                 tile_m=None, tile_k=None, mlp_resident_weights=None,
                 gelu_approximate=False):
        self.dim_media = dim_visual
        self.num_tokens_per_media = num_patches
        self.dim_out = dim_out
        self.mm_projector_type = mm_projector_type
        # bf16 MXU operands by default (f32 accumulation); pass float32 for
        # exact parity with an f32-weight PyTorch model.
        self.compute_dtype = jnp.dtype(compute_dtype)
        self.out_dtype = jnp.dtype(out_dtype) if out_dtype is not None else None
        self.mlp_resident_weights = mlp_resident_weights
        self.gelu_approximate = bool(gelu_approximate)

        self._budget = _vmem_budget_bytes()
        if tile_m is None:
            # 128 MiB parts (v5e/v6e) take much larger M tiles than v7x (64 MiB).
            tile_m = 1024 if self._budget >= 96 * _MIB else 512
        self.tile_m = int(tile_m)
        self.tile_k = int(tile_k) if tile_k is not None else None

        d_out_p = _round_up(dim_out, _LANE)   # lane-dense output / hidden dim
        self._d_out_p = d_out_p

        def init_linear(k, fan_in, fan_out):
            # Mimics nn.Linear default init: U(-1/sqrt(fan_in), 1/sqrt(fan_in)).
            kw, kb = jax.random.split(k)
            bound = 1.0 / math.sqrt(fan_in)
            w = jax.random.uniform(kw, (fan_out, fan_in), jnp.float32,
                                   minval=-bound, maxval=bound)
            bb = jax.random.uniform(kb, (fan_out,), jnp.float32,
                                    minval=-bound, maxval=bound)
            return w, bb

        def pad_to(a, shape):
            return jnp.pad(a, [(0, t - s) for s, t in zip(a.shape, shape)])

        mlp_match = re.match(r"^mlp(\d+)x_gelu$", mm_projector_type)

        if mm_projector_type == "linear":
            w, bb = init_linear(key, dim_visual, dim_out)
            self.ref_params = {"w": w, "b": bb}          # f32, PyTorch layout
            # Pre-transposed, lane-padded, pre-cast, kernel-ready (done once).
            self.params = {
                "w_t": pad_to(w.T, (dim_visual, d_out_p)).astype(self.compute_dtype),
                "b": pad_to(bb.reshape(1, -1), (1, d_out_p)),   # bias stays f32
            }
        elif mlp_match and int(mlp_match.group(1)) == 2:
            k1, k2 = jax.random.split(key)
            w1, b1 = init_linear(k1, dim_visual, dim_out)
            w2, b2 = init_linear(k2, dim_out, dim_out)
            self.ref_params = {"w1": w1, "b1": b1, "w2": w2, "b2": b2}
            self.params = {
                "w1_t": pad_to(w1.T, (dim_visual, d_out_p)).astype(self.compute_dtype),
                "b1": pad_to(b1.reshape(1, -1), (1, d_out_p)),
                "w2_t": pad_to(w2.T, (d_out_p, d_out_p)).astype(self.compute_dtype),
                "b2": pad_to(b2.reshape(1, -1), (1, d_out_p)),
            }
        elif mlp_match:
            # TODO(synk): mlp{N}x_gelu with N>2 would chain the fused
            # linear+GELU kernel N-1 times; only linear / mlp2x_gelu wired up.
            raise NotImplementedError(
                f"mlp depth {mlp_match.group(1)} not implemented")
        else:
            raise ValueError(f"Unknown projector type: {mm_projector_type}")

    def __call__(self, x):
        # x: (b, T, F, v, d_visual)   (feature dim last -> lane axis)
        b, T, F_, v, d = x.shape
        assert d == self.dim_media
        M = b * T * F_ * v
        out_dtype = self.out_dtype if self.out_dtype is not None else x.dtype

        # Single wrapper-side cast: bf16 operands halve x DMA bytes & VMEM.
        x2d = x.reshape(M, d)
        if x2d.dtype != self.compute_dtype:
            x2d = x2d.astype(self.compute_dtype)

        # M tiling: no wrapper-side pad. Rows are independent and the ragged
        # last block's junk tail rows are masked on writeback, so the grid is
        # simply ceil(M / tile_m).
        if M <= _SUBLANE:
            tile_m = M                       # block == full dim (layout-legal)
        else:
            tile_m = min(self.tile_m, _round_up(M, _SUBLANE))
            tile_m = _round_up(tile_m, _SUBLANE)
            if tile_m >= M and M >= 2 * _SUBLANE:
                # Keep >= 2 M tiles so v7x's second TensorCore gets work;
                # costs only one extra ~0.35us grid step on 1-TC parts.
                tile_m = _round_up(_cdiv(M, 2), _SUBLANE)

        p = self.params
        if self.mm_projector_type == "linear":
            y2d = _proj_linear(x2d, p["w_t"], p["b"], tile_m=tile_m,
                               out_dtype=out_dtype, budget=self._budget)
        else:  # mlp2x_gelu
            y2d = _proj_mlp2x(x2d, p["w1_t"], p["b1"], p["w2_t"], p["b2"],
                              tile_m=tile_m, tile_k=self.tile_k,
                              out_dtype=out_dtype, budget=self._budget,
                              resident=self.mlp_resident_weights,
                              approx_gelu=self.gelu_approximate)

        # Strip lane padding (a no-op when dim_out is already 128-aligned) and
        # rearrange '(b T) (F v) d -> b T (F v) d'.
        y2d = y2d[:, :self.dim_out]
        return y2d.reshape(b, T, F_ * v, self.dim_out)


# ----------------------------- reference & test -------------------------------


def _reference(module, x):
    b, T, F_, v, d = x.shape
    x2d = x.reshape(b * T * F_ * v, d).astype(jnp.float32)
    hp = jax.lax.Precision.HIGHEST
    p = module.ref_params
    if module.mm_projector_type == "linear":
        y = jnp.matmul(x2d, p["w"].T, precision=hp) + p["b"]
    else:
        h = jnp.matmul(x2d, p["w1"].T, precision=hp) + p["b1"]
        h = _gelu(h, module.gelu_approximate)
        y = jnp.matmul(h, p["w2"].T, precision=hp) + p["b2"]
    return y.reshape(b, T, F_ * v, -1).astype(x.dtype)


if __name__ == "__main__":
    key = jax.random.PRNGKey(0)
    k_x, k_lin, k_mlp = jax.random.split(key, 3)

    # Small shapes: b=2, T=2, F=2, v=8 patches/frame, dim_visual=32 -> M = 64.
    b, T, F_, v = 2, 2, 2, 8
    dim_visual = 32
    num_patches = F_ * v
    x = jax.random.normal(k_x, (b, T, F_, v, dim_visual), dtype=jnp.float32)

    # 1) linear, f32 MXU operands (exact parity check); tile_m=24 exercises a
    #    multi-step M grid with a ragged last block (64 rows -> 3 tiles of 24).
    mod_lin_f32 = LinearPatchProjection(
        "linear", dim_visual=dim_visual, dim_out=64, num_patches=num_patches,
        key=k_lin, compute_dtype=jnp.float32, tile_m=24)
    y_lin_f32 = jax.block_until_ready(mod_lin_f32(x))
    ref_lin = _reference(mod_lin_f32, x)
    assert y_lin_f32.shape == (b, T, num_patches, 64)
    assert jnp.allclose(y_lin_f32, ref_lin, atol=2e-4, rtol=2e-4)

    # 2) linear, default bf16 MXU operands (x pre-cast once in the wrapper).
    mod_lin = LinearPatchProjection(
        "linear", dim_visual=dim_visual, dim_out=64, num_patches=num_patches,
        key=k_lin, tile_m=32)
    y_lin = jax.block_until_ready(mod_lin(x))
    assert y_lin.shape == (b, T, num_patches, 64)
    assert jnp.allclose(y_lin, ref_lin, atol=3e-2, rtol=3e-2)

    # 3) mlp2x_gelu, default fused RESIDENT-weights path, bf16 operands.
    mod_mlp = LinearPatchProjection(
        "mlp2x_gelu", dim_visual=dim_visual, dim_out=256,
        num_patches=num_patches, key=k_mlp, tile_m=16)
    y_mlp = jax.block_until_ready(mod_mlp(x))
    ref_mlp = _reference(mod_mlp, x)
    assert y_mlp.shape == (b, T, num_patches, 256)
    assert jnp.allclose(y_mlp, ref_mlp, atol=5e-2, rtol=5e-2)

    # 4) mlp2x_gelu, forced hidden-chunked fallback path: f32 output is
    #    accumulated directly in the resident output block (no scratch).
    mod_mlp_chunk = LinearPatchProjection(
        "mlp2x_gelu", dim_visual=dim_visual, dim_out=256,
        num_patches=num_patches, key=k_mlp, tile_m=16, tile_k=128,
        mlp_resident_weights=False)
    y_chunk = jax.block_until_ready(mod_mlp_chunk(x))
    assert y_chunk.shape == (b, T, num_patches, 256)
    assert jnp.allclose(y_chunk, ref_mlp, atol=5e-2, rtol=5e-2)

    print("KERNEL_OK")
</pallas_src>

<mosaic_0001>
module attributes {stable_mosaic.version = 11 : i64} {
  func.func @_linear_kernel(%arg0: i32, %arg1: i32, %arg2: memref<24x32xf32, #tpu.memory_space<vmem>>, %arg3: memref<32x128xf32, #tpu.memory_space<vmem>>, %arg4: memref<1x128xf32, #tpu.memory_space<vmem>>, %arg5: memref<24x128xf32, #tpu.memory_space<vmem>>) attributes {dimension_semantics = [#tpu.dimension_semantics<parallel>, #tpu.dimension_semantics<parallel>], iteration_bounds = array<i64: 3, 1>, scalar_prefetch = 0 : i64, scratch_operands = 0 : i64, tpu.core_type = #tpu.core_type<tc>, window_params = [{transform_indices = @transform_0, window_bounds = array<i64: 24, 32>}, {pipeline_mode = #tpu.pipeline_mode<synchronous>, transform_indices = @transform_1, window_bounds = array<i64: 32, 128>}, {pipeline_mode = #tpu.pipeline_mode<synchronous>, transform_indices = @transform_2, window_bounds = array<i64: 1, 128>}, {transform_indices = @transform_3, window_bounds = array<i64: 24, 128>}]} {
    %c0 = arith.constant 0 : index
    %c0_0 = arith.constant 0 : index
    %0 = vector.load %arg2[%c0, %c0_0] : memref<24x32xf32, #tpu.memory_space<vmem>>, vector<24x32xf32>
    %c0_1 = arith.constant 0 : index
    %c0_2 = arith.constant 0 : index
    %1 = vector.load %arg3[%c0_1, %c0_2] : memref<32x128xf32, #tpu.memory_space<vmem>>, vector<32x128xf32>
    %cst = arith.constant dense<0.000000e+00> : vector<24x128xf32>
    %2 = tpu.matmul %0, %1, %cst {dimension_numbers = #tpu.dot_dimension_numbers<[1], [0], [0], [1], [0, 0, 1, 1], [], []>} : vector<24x32xf32>, vector<32x128xf32>, vector<24x128xf32> -> vector<24x128xf32>
    %c0_3 = arith.constant 0 : index
    %c0_4 = arith.constant 0 : index
    %3 = vector.load %arg4[%c0_3, %c0_4] : memref<1x128xf32, #tpu.memory_space<vmem>>, vector<1x128xf32>
    %4 = vector.broadcast %3 : vector<1x128xf32> to vector<24x128xf32>
    %5 = arith.addf %2, %4 : vector<24x128xf32>
    %c0_5 = arith.constant 0 : index
    %c0_6 = arith.constant 0 : index
    %6 = vector.load %arg5[%c0_5, %c0_6] : memref<24x128xf32, #tpu.memory_space<vmem>>, vector<24x128xf32>
    tpu.vector_store %arg5[%c0_5, %c0_6], %5 {strides = array<i32>} : memref<24x128xf32, #tpu.memory_space<vmem>>, vector<24x128xf32>,
    return
  }
  func.func @transform_0(%arg0: i32, %arg1: i32) -> (i32, i32) {
    %c0_i32 = arith.constant 0 : i32
    %c0_i32_0 = arith.constant 0 : i32
    return %arg0, %c0_i32 : i32, i32
  }
  func.func @transform_1(%arg0: i32, %arg1: i32) -> (i32, i32) {
    %c0_i32 = arith.constant 0 : i32
    %c0_i32_0 = arith.constant 0 : i32
    %c0_i32_1 = arith.constant 0 : i32
    return %c0_i32, %c0_i32_0 : i32, i32
  }
  func.func @transform_2(%arg0: i32, %arg1: i32) -> (i32, i32) {
    %c0_i32 = arith.constant 0 : i32
    %c0_i32_0 = arith.constant 0 : i32
    %c0_i32_1 = arith.constant 0 : i32
    return %c0_i32, %c0_i32_0 : i32, i32
  }
  func.func @transform_3(%arg0: i32, %arg1: i32) -> (i32, i32) {
    %c0_i32 = arith.constant 0 : i32
    return %arg0, %arg1 : i32, i32
  }
}

</mosaic_0001>

<bundles_post_ra>
// kernel: tpu_custom_call.1
= control target key start
LH: loop header
LB: loop body
LE: loop exit
PB: predicated region body
PF: predicated region fallthrough
CT: control target
= control target key end

     0   :  { %8 = vsyncpa [#allocation3], 0  ;;  %s775_s0 = inlined_call_operand.vmem [shape: f32[64,32], index: 0, kind: input, shape index: {}]   ;;  %s776_s1 = inlined_call_operand.vmem [shape: f32[32,128], index: 1, kind: input, shape index: {}]   ;;  %s777_s2 = inlined_call_operand.vmem [shape: f32[1,128], index: 2, kind: input, shape index: {}]   ;;  %s778_s3 = inlined_call_operand.hbm [shape: f32[64,128], index: 3, kind: output, shape index: {}]  }
   0x1   :  { %10 = vsyncpa [#allocation3 + $0x1], 0  ;;  %s628_s12 = smov 0   ;;  %s630_s13 = smov 0  }
   0x2   :  { %s632_s14 = smov 0   ;;  %s634_s15 = smov 0  }
   0x3   :  { %s636_s16 = smov 0   ;;  %s638_s17 = smov 0  }
   0x4 LB: > { %s410_s18 = sadd.s32 4294967295, %s600_s17   ;;  %s411_s19 = sadd.s32 4294967294, %s600_s17   ;;  %s600_s17 = sphi %s638_s17, %s16_s17   ;;  %s596_s16 = sphi %s636_s16, %s785_s16   ;;  %s592_s15 = sphi %s634_s15, %s784_s15   ;;  %s588_s14 = sphi %s632_s14, %s783_s14   ;;  %s584_s13 = sphi %s630_s13, %s782_s13   ;;  %s580_s12 = sphi %s628_s12, %s781_s12  }
   0x5   : > { %s28_s20 = sadd.s32 1, %s596_s16  ;;  %s105_s21 = sadd.s32 1, %s588_s14 }
   0x6   : > { %p30_p0 = scmp.ge.s32.totalorder %s28_s20, 3  ;;  %p115_p1 = scmp.ne.s32.totalorder %s588_s14, %s584_s13 }
   0x7   : > { %p116_p2 = scmp.eq.s32.totalorder %s410_s18, 2  ;;  %p121_p3 = scmp.ne.s32.totalorder %s584_s13, %s580_s12 }
   0x8   : > { %s787_s20 = smov (%p30_p0, %s28_s20), 0  ;;  %p122_p5 = scmp.eq.s32.totalorder %s411_s19, 2 }
   0x9   : > { %p668_p4 = por %p116_p2, %p115_p1  ;;  %s100_s23 = ssub.s32 %s596_s16, %s787_s20 }
   0xa   : > { %p414_p6 = scmp.ge.s32.totalorder %s600_s17, 1  ;;  %p103_p7 = scmp.eq.s32.totalorder %s100_s23, 0 }
   0xb   : > { %p675_p8 = por %p122_p5, %p121_p3  ;;  %p163_p9 = scmp.lt.s32.totalorder %s600_s17, 4 }
   0xc   : > { %s681_s25 = scalar_select %p103_p7, %s588_s14, %s105_s21  }
   0xd   : > { %p164_p10 = pnand %p414_p6, %p163_p9 }
   0xe   : > { %v213_v0 = vld [vmem:[%s776_s1] sm:$0xff] (!%p164_p10)  ;;  %v214_v1 = vld [vmem:[%s776_s1 + $0x8] sm:$0xff] (!%p164_p10)  ;;  %v215_v2 = vld [vmem:[%s776_s1 + $0x10] sm:$0xff] (!%p164_p10)  ;;  %v602_v3 = vmov (!%p164_p10), 0.0|0.0   ;;  %s696_s7 = smul.u32 (!%p164_p10), 3, %s592_s15  ;;  %vm603_vm0 = vmmov (!%p164_p10), 0  }
   0xf   : > { %167 = sbr.rel (%p164_p10) target bundleno = 274 (0x112), region = 32  ;;  %458 = vmatprep.subr.bf16.mxu1 (!%p164_p10), %v602_v3  ;;  %v453_v4 = vpack.c.bf16 (!%p164_p10), %v214_v1, %v213_v0  ;;  %452 = vmatprep.subr.bf16.mxu0 (!%p164_p10), %v602_v3  ;;  %v216_v5 = vld [vmem:[%s776_s1 + $0x18] sm:$0xff] (!%p164_p10)  ;;  %v604_v6 = vmov (!%p164_p10), 0.0   ;;  %vm224_vm1 = vcmask (!%p164_p10), 261120   ;;  %s188_s19 = sand.u32 (!%p164_p10), 1, %s584_s13  }
  0x10   : > { %446 = vmatprep.mubr.msk.f32.mxu1 (!%p164_p10), %vm603_vm0, %v604_v6  ;;  %443 = vmatprep.mubr.msk.f32.mxu0 (!%p164_p10), %vm603_vm0, %v604_v6  ;;  %v456_v7 = vpack.c.bf16 (!%p164_p10), %v216_v5, %v215_v2  ;;  %p196_p11 = scmp.lt.s32.totalorder (!%p164_p10), %s696_s7, 7  ;;  %s462_s21 = smul.u32 (!%p164_p10), 24, %s188_s19  ;;  %v416_v11 = vld [vmem:[%s777_s2] ss:$0 sm:$0xff] (!%p164_p10) }
  0x11   : > { %460 = vmatpush3.bf16.msra.mxu1 (!%p164_p10), %v453_v4  ;;  %454 = vmatpush3.bf16.msra.mxu0 (!%p164_p10), %v453_v4  ;;  %s710_s28 = scalar_lea.sflag (!%p164_p10), [#allocation3], %s188_s19 }
  0x12   : > { %459 = vmatprep.subr.bf16.mxu1 (!%p164_p10), %v602_v3  ;;  %455 = vmatprep.subr.bf16.mxu0 (!%p164_p10), %v602_v3  ;;  %s190_s27 = scalar_lea.vmem (!%p164_p10), [#allocation2], %s462_s21 }
  0x15   : > { %461 = vmatpush3.bf16.msra.mxu1 (!%p164_p10), %v456_v7  ;;  %457 = vmatpush3.bf16.msra.mxu0 (!%p164_p10), %v456_v7 }
  0x16   : > { %s197_s8 = scalar_select %p196_p11, %s696_s7, 7 }
  0x17   : > { %s326_s29 = ssub.s32 (%p668_p4), 8, %s696_s7 }
  0x18   : > { %s415_s9 = sshll.u32 %s197_s8, 3  ;;  %p327_p12 = scmp.lt.s32.totalorder (%p668_p4), %s326_s29, 3 }
  0x19   : > { %s199_s18 = scalar_lea.vmem %s775_s0, %s415_s9 }
  0x1a   : > { %v211_v8 = vld [vmem:[%s199_s18 + $0x8] sm:$0xff]  ;;  %v210_v9 = vld [vmem:[%s199_s18] sm:$0xff]  ;;  %v212_v10 = vld [vmem:[%s199_s18 + $0x10] sm:$0xff] }
  0x1b   : > { %447 = vmatmul.mubr.msk.f32.vlgmr.msra.gmra.mrb[0].mxu1 %vm224_vm1, %v211_v8  ;;  %444 = vmatmul.mubr.msk.f32.vlgmr.msra.gmra.mrb[0].mxu0 %vm224_vm1, %v210_v9 }
  0x1c   : > { %449 = vmatprep.mubr.msk.f32.mxu1 %vm603_vm0, %v604_v6 }
  0x1f   : > { %450 = vmatmul.mubr.msk.f32.gmra.mrb[2].mxu1 %vm224_vm1, %v212_v10 }
  0xee   : > { %v305_v12 = vpop.f32.mrb[0].mxu1  ;;  %v300_v13 = vpop.f32.mrb[0].mxu0 }
  0xef   : > { %v306_v14 = vadd.f32 %v416_v11, %v305_v12  ;;  %v448_v15 = vpop.f32.mrb[1].mxu1  ;;  %v301_v16 = vadd.f32 %v416_v11, %v300_v13  ;;  %v445_v17 = vpop.f32.mrb[1].mxu0  ;;  %324 = sbr.rel (!%p668_p4) target bundleno = 274 (0x112), region = 36 }
  0xf1   : > { %315 = vst [vmem:[%s190_s27 + $0x8] sm:$0xff] %v306_v14  ;;  %314 = vst [vmem:[%s190_s27] sm:$0xff] %v301_v16 }
  0xf2   : > { %v310_v18 = vpop.f32.mrb[2].mxu1 }
  0xf3   : > { %v311_v19 = vadd.f32 %v416_v11, %v310_v18  ;;  %v451_v20 = vpop.f32.mrb[3].mxu1 }
  0xf5   : > { %316 = vst [vmem:[%s190_s27 + $0x10] sm:$0xff] %v311_v19 }
  0xf6   : > { %s789_s29 = smov (!%p327_p12, %s326_s29), 3 }
  0xf7   : > { %s715_s30 = sshll.u32 %s789_s29, 7 }
  0xf8   : > { %s331_s4 = ssub.s32 384, %s715_s30 }
  0xf9   : > { %332 = vsyncadd %s710_s28, %s331_s4  ;;  %p421_p13 = scmp.ne.s32.totalorder %s715_s30, 0  ;;  %s427_s5 = smul.u32 384, %s592_s15 }
  0xfa   : > { %s338_s6 = sshll.u32 %s190_s27, 4  ;;  %s605_s10 = smov [#allocation2]   ;;  %s726_s6 = int_to_ptr.vmem [resolvable:$true] %s338_s6 }
  0xfb   : > { %s724_s9 = scalar_lea.hbm %s778_s3, %s427_s5  ;;  %s522_s7 = scalar_lea.vmem %s726_s6, %s715_s30 }
  0xfc   : > { %p523_p0 = scmp.ne.s32.totalorder %s726_s6, %s522_s7  ;;  %s526_s11 = sshll.u32 %s605_s10, 4  ;;  %s527_s11 = int_to_ptr.vmem [resolvable:$false] %s526_s11 }
  0xfd   : > { %s528_s15 = scalar_lea.vmem %s527_s11, 768  ;;  %p529_p3 = scmp.lt.s32.totalorder %s726_s6, %s527_s11 }
  0xfe   : > { %p524_p1 = pnand %p523_p0, %p421_p13  ;;  %p530_p4 = scmp.lt.s32.totalorder %s528_s15, %s522_s7 }
 0x100   : > { %p525_p2 = pneg %p524_p1  ;;  %p531_p5 = por %p530_p4, %p529_p3 }
 0x102   : > { %p532_p6 = pnand %p531_p5, %p525_p2 }
 0x104   : > { %535 = shalt.err (!%p532_p6)
}
 0x105   : > { %s536_s18 = scalar_lea.hbm %s724_s9, %s715_s30  ;;  %s540_s23 = scalar_lea.hbm %s778_s3, 1024 }
 0x106   : > { %p537_p7 = scmp.ne.s32.totalorder %s724_s9, %s536_s18  ;;  %p541_p11 = scmp.lt.u32.totalorder %s724_s9, %s778_s3 }
 0x107   : > { %p542_p12 = scmp.lt.u32.totalorder %s540_s23, %s536_s18  ;;  %p544_p1 = scmp.lt.u32.totalorder %s536_s18, %s724_s9 }
 0x108   : > { %p538_p9 = pnand %p537_p7, %p421_p13 }
 0x109   : > { %p543_p0 = por %p542_p12, %p541_p11 }
 0x10a   : > { %p539_p10 = pneg %p538_p9 }
 0x10b   : > { %p545_p2 = por %p544_p1, %p543_p0 }
 0x10d   : > { %p546_p3 = pnand %p545_p2, %p539_p10 }
 0x10f   : > { %549 = shalt.err (!%p546_p3)
}
 0x110   : > { %s606_s29 = smov 128   ;;  %s607_s4 = smov 8  }
 0x111   : > { %344 = dma.vmem_to_hbm [thread:$0]  (%p421_p13), %s726_s6, %s715_s30, %s724_s9, %s710_s28, %s606_s29, %s606_s29, %s607_s4  }
 0x112 PF: > { %p468_p4 = scmp.ge.s32.totalorder %s600_s17, 2  ;;  %s353_s5 = sand.u32 1, %s580_s12  }
 0x113   : > { %s354_s8 = scalar_lea.sflag [#allocation3], %s353_s5 }
 0x114   : > { %p465_p5 = pnand %p468_p4, %p675_p8 }
 0x116   : > { %575 = dma.done.wait (!%p465_p5), %s354_s8, 384  }
 0x117   : > { %577 = vsyncadd (!%p465_p5), %s354_s8, 4294966912  ;;  %s16_s17 = sadd.s32 1, %s600_s17   ;;  %s781_s12 = smov %s584_s13 }
 0x118   : > { %p13_p6 = scmp.ge.s32.totalorder %s16_s17, 5   ;;  %s782_s13 = smov %s588_s14 }
 0x119   : > { %s783_s14 = smov %s681_s25  ;;  %s784_s15 = smov %s596_s16 }
 0x11a   : > { %s785_s16 = smov %s787_s20  ;;  %15 = sbr.rel (!%p13_p6) target bundleno = 4 (0x4), region = 67 }
 0x121   :  { %359 = vsyncpa [#allocation3], 1 }
 0x122   :  { %361 = vsyncpa [#allocation3 + $0x1], 1 }

</bundles_post_ra>
